<compile_context>
chip_gen: v7x
topology: tpu7x:2x2x1
jax: 0.10.0
libtpu: 0.0.40
codegen_flags: <defaults>
</compile_context>

<pallas_src>
import functools

import jax
import jax.numpy as jnp
from jax.experimental import pallas as pl
from jax.experimental.pallas import tpu as pltpu


# ---------------------------------------------------------------------------
# Hardware-aware defaults
# ---------------------------------------------------------------------------

def _vmem_limit_bytes():
    """~75% of this generation's VMEM (96 MiB on v5e/v6e, 48 MiB on v7x)."""
    cap = 64 * 1024 * 1024
    try:
        info = pltpu.get_tpu_info()
        cap = int(getattr(info, "vmem_capacity_bytes", cap) or cap)
    except Exception:
        pass
    return int(cap * 3 // 4)


_VMEM_LIMIT = _vmem_limit_bytes()
_MXU_DTYPE = jnp.bfloat16     # MXU operand dtype (accumulation is always f32)
_ACT_DTYPE = jnp.bfloat16     # intermediate activations (q / kv / attention out)


def _pick_block(dim, target, align):
    """Largest multiple of `align` dividing `dim` and <= target, else full dim."""
    if dim <= target:
        return dim
    t = (target // align) * align
    while t >= align:
        if dim % t == 0:
            return t
        t -= align
    return dim


# ---------------------------------------------------------------------------
# Tiled matmul (optional fused bias).  bf16 MXU operands, f32 accumulation.
# ---------------------------------------------------------------------------

def _mm_k1_kernel(x_ref, w_ref, o_ref):
    o_ref[...] = jnp.dot(x_ref[...].astype(_MXU_DTYPE), w_ref[...].astype(_MXU_DTYPE),
                         preferred_element_type=jnp.float32).astype(o_ref.dtype)


def _mm_k1_bias_kernel(x_ref, w_ref, b_ref, o_ref):
    y = jnp.dot(x_ref[...].astype(_MXU_DTYPE), w_ref[...].astype(_MXU_DTYPE),
                preferred_element_type=jnp.float32)
    o_ref[...] = (y + b_ref[...].astype(jnp.float32)).astype(o_ref.dtype)


def _mm_kernel(x_ref, w_ref, o_ref, acc_ref):
    @pl.when(pl.program_id(2) == 0)
    def _init():
        acc_ref[...] = jnp.zeros_like(acc_ref)

    acc_ref[...] += jnp.dot(x_ref[...].astype(_MXU_DTYPE), w_ref[...].astype(_MXU_DTYPE),
                            preferred_element_type=jnp.float32)

    @pl.when(pl.program_id(2) == pl.num_programs(2) - 1)
    def _fin():
        o_ref[...] = acc_ref[...].astype(o_ref.dtype)


def _mm_bias_kernel(x_ref, w_ref, b_ref, o_ref, acc_ref):
    @pl.when(pl.program_id(2) == 0)
    def _init():
        acc_ref[...] = jnp.zeros_like(acc_ref)

    acc_ref[...] += jnp.dot(x_ref[...].astype(_MXU_DTYPE), w_ref[...].astype(_MXU_DTYPE),
                            preferred_element_type=jnp.float32)

    @pl.when(pl.program_id(2) == pl.num_programs(2) - 1)
    def _fin():
        o_ref[...] = (acc_ref[...] + b_ref[...].astype(jnp.float32)).astype(o_ref.dtype)


def matmul(x, w, b=None, *, tm=512, tn=512, tk=1024, out_dtype=None):
    """y = x @ w (+ b).  x: (M, K), w: (K, O), b: (O,) or None."""
    M0, K = x.shape
    O = w.shape[1]
    out_dtype = out_dtype or x.dtype

    # Row blocking with a padding fallback when M has no aligned divisor <= tm.
    if M0 <= tm:
        bm, pad = M0, 0
    else:
        bm = _pick_block(M0, tm, 8)
        if bm == M0:
            pad = (-M0) % tm
            bm = tm
        else:
            pad = 0
    if pad:
        x = jnp.pad(x, ((0, pad), (0, 0)))
    M = M0 + pad

    bk = _pick_block(K, tk, 128)
    bn = _pick_block(O, tn, 128)

    # Keep at least 2 parallel blocks (both v7x TensorCores busy) when possible.
    if (M // bm) * (O // bn) < 2:
        half = _pick_block(M, max(8, bm // 2), 8)
        if half < bm:
            bm = half

    has_bias = b is not None
    operands = [x, w] + ([b.reshape(1, O)] if has_bias else [])

    if bk == K:
        # Single K step: no accumulator scratch, direct store.
        grid = (M // bm, O // bn)
        in_specs = [pl.BlockSpec((bm, bk), lambda i, j: (i, 0)),
                    pl.BlockSpec((bk, bn), lambda i, j: (0, j))]
        if has_bias:
            in_specs.append(pl.BlockSpec((1, bn), lambda i, j: (0, j)))
        out = pl.pallas_call(
            _mm_k1_bias_kernel if has_bias else _mm_k1_kernel,
            out_shape=jax.ShapeDtypeStruct((M, O), out_dtype),
            grid=grid,
            in_specs=in_specs,
            out_specs=pl.BlockSpec((bm, bn), lambda i, j: (i, j)),
            compiler_params=pltpu.CompilerParams(
                dimension_semantics=("parallel", "parallel"),
                vmem_limit_bytes=_VMEM_LIMIT),
        )(*operands)
    else:
        grid = (M // bm, O // bn, K // bk)
        in_specs = [pl.BlockSpec((bm, bk), lambda i, j, k: (i, k)),
                    pl.BlockSpec((bk, bn), lambda i, j, k: (k, j))]
        if has_bias:
            in_specs.append(pl.BlockSpec((1, bn), lambda i, j, k: (0, j)))
        out = pl.pallas_call(
            _mm_bias_kernel if has_bias else _mm_kernel,
            out_shape=jax.ShapeDtypeStruct((M, O), out_dtype),
            grid=grid,
            in_specs=in_specs,
            out_specs=pl.BlockSpec((bm, bn), lambda i, j, k: (i, j)),
            scratch_shapes=[pltpu.VMEM((bm, bn), jnp.float32)],
            compiler_params=pltpu.CompilerParams(
                dimension_semantics=("parallel", "parallel", "arbitrary"),
                vmem_limit_bytes=_VMEM_LIMIT),
        )(*operands)

    return out[:M0] if pad else out


# ---------------------------------------------------------------------------
# Fused stride==kernel spatial-reduction conv + bias + LayerNorm.
# The sr tap-rows are gathered by the grid/index_map on a free reshape of x
# (no host-side patch transpose).
# ---------------------------------------------------------------------------

def _sr_conv_ln_kernel(x_ref, w_ref, b_ref, g_ref, bb_ref, o_ref, acc_ref, *, eps):
    # x_ref : (1, bHs, 1, Ws, sr*C)  input rows for conv tap-row dh = program_id(2)
    # w_ref : (1, sr*C, C)           weight slab for this tap row (rows = (dw, c_in))
    # o_ref : (1, bHs, Ws, C)
    # acc   : (bHs, Ws, C) f32
    t = pl.program_id(2)
    bHs = acc_ref.shape[0]

    @pl.when(t == 0)
    def _init():
        acc_ref[...] = jnp.zeros_like(acc_ref)

    w_bf = w_ref[0].astype(_MXU_DTYPE)                      # (sr*C, C)

    def body(i, carry):
        xr = x_ref[0, i, 0].astype(_MXU_DTYPE)              # (Ws, sr*C)
        acc_ref[i] += jnp.dot(xr, w_bf, preferred_element_type=jnp.float32)
        return carry

    jax.lax.fori_loop(0, bHs, body, 0, unroll=bHs <= 8)

    @pl.when(t == pl.num_programs(2) - 1)
    def _fin():
        y = acc_ref[...] + b_ref[...].astype(jnp.float32)   # (bHs, Ws, C)
        mu = jnp.mean(y, axis=-1, keepdims=True)
        yc = y - mu
        var = jnp.mean(yc * yc, axis=-1, keepdims=True)
        inv = jax.lax.rsqrt(var + eps)
        o_ref[0] = (yc * inv * g_ref[...].astype(jnp.float32)
                    + bb_ref[...].astype(jnp.float32)).astype(o_ref.dtype)


def sr_conv_layernorm(x, H, W, sr, w_sr, b_sr, ln_g, ln_b, *, eps=1e-5,
                      out_dtype=None, rows_target=1024):
    """Conv2d(C->C, kernel=sr, stride=sr) + bias + LayerNorm(C), fused.

    x: (B, N=H*W, C) row-major over (h, w).  w_sr: (sr, sr*C, C), rows ordered
    (dw, c_in).  Returns (B, (H//sr)*(W//sr), C).
    """
    B, N, C = x.shape
    assert N == H * W and H % sr == 0 and W % sr == 0
    Hs, Ws = H // sr, W // sr
    out_dtype = out_dtype or x.dtype

    # Free, contiguous reshape: the dh tap axis becomes addressable by the grid.
    x5 = x.reshape(B, Hs, sr, Ws, sr * C)

    bHs = _pick_block(Hs, max(1, rows_target // max(Ws, 1)), 1)
    grid = (B, Hs // bHs, sr)

    out = pl.pallas_call(
        functools.partial(_sr_conv_ln_kernel, eps=eps),
        out_shape=jax.ShapeDtypeStruct((B, Hs, Ws, C), out_dtype),
        grid=grid,
        in_specs=[
            pl.BlockSpec((1, bHs, 1, Ws, sr * C), lambda b, i, t: (b, i, t, 0, 0)),
            pl.BlockSpec((1, sr * C, C), lambda b, i, t: (t, 0, 0)),
            pl.BlockSpec((1, C), lambda b, i, t: (0, 0)),
            pl.BlockSpec((1, C), lambda b, i, t: (0, 0)),
            pl.BlockSpec((1, C), lambda b, i, t: (0, 0)),
        ],
        out_specs=pl.BlockSpec((1, bHs, Ws, C), lambda b, i, t: (b, i, 0, 0)),
        scratch_shapes=[pltpu.VMEM((bHs, Ws, C), jnp.float32)],
        compiler_params=pltpu.CompilerParams(
            dimension_semantics=("parallel", "parallel", "arbitrary"),
            vmem_limit_bytes=_VMEM_LIMIT),
    )(x5, w_sr, b_sr.reshape(1, C), ln_g.reshape(1, C), ln_b.reshape(1, C))
    return out.reshape(B, Hs * Ws, C)


# ---------------------------------------------------------------------------
# Multi-head attention.  Softmax scale is pre-folded into the q projection.
#   * single-pass kernel when the whole KV fits in one block (Segformer case)
#   * online-softmax fallback with per-head scratch accumulators otherwise
# ---------------------------------------------------------------------------

def _attn_single_kernel(q_ref, kv_ref, o_ref, *, num_heads):
    # q_ref: (1, bq, C), kv_ref: (1, Nk, 2C) = [k heads | v heads], o_ref: (1, bq, C)
    C = q_ref.shape[2]
    hd = C // num_heads
    qv = q_ref[0]
    kvv = kv_ref[0]
    outs = []
    for h in range(num_heads):
        qh = qv[:, h * hd:(h + 1) * hd].astype(_MXU_DTYPE)
        kh = kvv[:, h * hd:(h + 1) * hd].astype(_MXU_DTYPE)
        vh = kvv[:, C + h * hd:C + (h + 1) * hd].astype(_MXU_DTYPE)
        s = jax.lax.dot_general(qh, kh, (((1,), (1,)), ((), ())),
                                preferred_element_type=jnp.float32)      # (bq, Nk)
        m = jnp.max(s, axis=-1, keepdims=True)
        p = jnp.exp(s - m)
        l = jnp.sum(p, axis=-1, keepdims=True)
        o_h = jnp.dot(p.astype(_MXU_DTYPE), vh, preferred_element_type=jnp.float32)
        outs.append((o_h * pl.reciprocal(l, approx=True)).astype(o_ref.dtype))
    o_ref[0] = jnp.concatenate(outs, axis=-1)        # one lane-dense (bq, C) store


def _attn_flash_kernel(q_ref, kv_ref, o_ref, m_ref, l_ref, acc_ref, *, num_heads):
    # Online-softmax fallback.  Scratch: m/l (H, bq, 1), acc (H, bq, hd) f32.
    C = q_ref.shape[2]
    hd = C // num_heads
    ki = pl.program_id(2)

    @pl.when(ki == 0)
    def _init():
        m_ref[...] = jnp.full_like(m_ref, -jnp.inf)
        l_ref[...] = jnp.zeros_like(l_ref)
        acc_ref[...] = jnp.zeros_like(acc_ref)

    qv = q_ref[0]
    kvv = kv_ref[0]
    for h in range(num_heads):
        qh = qv[:, h * hd:(h + 1) * hd].astype(_MXU_DTYPE)
        kh = kvv[:, h * hd:(h + 1) * hd].astype(_MXU_DTYPE)
        vh = kvv[:, C + h * hd:C + (h + 1) * hd].astype(_MXU_DTYPE)
        s = jax.lax.dot_general(qh, kh, (((1,), (1,)), ((), ())),
                                preferred_element_type=jnp.float32)      # (bq, bk)
        m_prev = m_ref[h]
        m_new = jnp.maximum(m_prev, jnp.max(s, axis=-1, keepdims=True))
        alpha = jnp.exp(m_prev - m_new)
        p = jnp.exp(s - m_new)
        l_ref[h] = alpha * l_ref[h] + jnp.sum(p, axis=-1, keepdims=True)
        m_ref[h] = m_new
        pv = jnp.dot(p.astype(_MXU_DTYPE), vh, preferred_element_type=jnp.float32)
        acc_ref[h] = alpha * acc_ref[h] + pv         # per-head in-place update

    @pl.when(ki == pl.num_programs(2) - 1)
    def _fin():
        o_ref[0] = jnp.concatenate(
            [(acc_ref[h] * pl.reciprocal(l_ref[h], approx=True)).astype(o_ref.dtype)
             for h in range(num_heads)], axis=-1)


def multihead_attention(q, kv, *, num_heads, tq=256, tkv=512, single_pass_max_kv=2048):
    """q: (B, N, C) (scale already folded into the q projection);
    kv: (B, Nk, 2C) with channels [k(all heads) | v(all heads)]."""
    B, N, C = q.shape
    _, Nk, C2 = kv.shape
    assert C2 == 2 * C and C % num_heads == 0

    bq = _pick_block(N, tq, 8)
    # keep >= 2 parallel blocks so both v7x TensorCores get work
    if B * (N // bq) < 2:
        half = _pick_block(N, max(8, bq // 2), 8)
        if half < bq:
            bq = half

    if Nk <= single_pass_max_kv:
        grid = (B, N // bq)
        return pl.pallas_call(
            functools.partial(_attn_single_kernel, num_heads=num_heads),
            out_shape=jax.ShapeDtypeStruct((B, N, C), q.dtype),
            grid=grid,
            in_specs=[pl.BlockSpec((1, bq, C), lambda b, qi: (b, qi, 0)),
                      pl.BlockSpec((1, Nk, 2 * C), lambda b, qi: (b, 0, 0))],
            out_specs=pl.BlockSpec((1, bq, C), lambda b, qi: (b, qi, 0)),
            compiler_params=pltpu.CompilerParams(
                dimension_semantics=("parallel", "parallel"),
                vmem_limit_bytes=_VMEM_LIMIT),
        )(q, kv)

    bk = _pick_block(Nk, tkv, 8)
    hd = C // num_heads
    grid = (B, N // bq, Nk // bk)
    return pl.pallas_call(
        functools.partial(_attn_flash_kernel, num_heads=num_heads),
        out_shape=jax.ShapeDtypeStruct((B, N, C), q.dtype),
        grid=grid,
        in_specs=[pl.BlockSpec((1, bq, C), lambda b, qi, ki: (b, qi, 0)),
                  pl.BlockSpec((1, bk, 2 * C), lambda b, qi, ki: (b, ki, 0))],
        out_specs=pl.BlockSpec((1, bq, C), lambda b, qi, ki: (b, qi, 0)),
        scratch_shapes=[pltpu.VMEM((num_heads, bq, 1), jnp.float32),
                        pltpu.VMEM((num_heads, bq, 1), jnp.float32),
                        pltpu.VMEM((num_heads, bq, hd), jnp.float32)],
        compiler_params=pltpu.CompilerParams(
            dimension_semantics=("parallel", "parallel", "arbitrary"),
            vmem_limit_bytes=_VMEM_LIMIT),
    )(q, kv)


# ---------------------------------------------------------------------------
# Module forward
# ---------------------------------------------------------------------------

def attention_forward(x, H, W, params, num_heads, sr_ratio,
                      attn_single_pass_max_kv=2048, attn_tkv=512):
    B, N, C = x.shape
    assert C % num_heads == 0
    hd = C // num_heads
    scale = hd ** (-0.5)

    x2 = x.reshape(B * N, C)

    # q projection (qkv_bias=False); softmax scale folded into the weight.
    q = matmul(x2, params["wq"] * scale, out_dtype=_ACT_DTYPE)          # (B*N, C)

    if sr_ratio > 1:
        Nk = (H // sr_ratio) * (W // sr_ratio)
        # fused stride==kernel conv + bias + LayerNorm, no host-side patch transpose
        x_ = sr_conv_layernorm(x, H, W, sr_ratio, params["w_sr"], params["b_sr"],
                               params["ln_g"], params["ln_b"], eps=1e-5,
                               out_dtype=_ACT_DTYPE)                    # (B, Nk, C)
        x_ = x_.reshape(B * Nk, C)
    else:
        Nk = N
        x_ = x2

    # kv projection (bias=False); channels = [k(all heads) | v(all heads)]
    kv = matmul(x_, params["wkv"], out_dtype=_ACT_DTYPE)                # (B*Nk, 2C)

    # multi-head attention (single-pass softmax when KV fits in one block)
    # TODO(synk): attn_drop / proj_drop are p=0.0 (identity); dropout for p > 0
    # would need pltpu.prng_seed / prng_random_bits.
    out = multihead_attention(q.reshape(B, N, C), kv.reshape(B, Nk, 2 * C),
                              num_heads=num_heads, tkv=attn_tkv,
                              single_pass_max_kv=attn_single_pass_max_kv)

    # output projection (has bias), back to the input dtype
    y = matmul(out.reshape(B * N, C), params["w_proj"], b=params["b_proj"],
               out_dtype=x.dtype)
    return y.reshape(B, N, C)


# ---------------------------------------------------------------------------
# Pure-JAX f32 reference (independent check; uses lax.conv for the sr branch)
# ---------------------------------------------------------------------------

def attention_reference(x, H, W, params, num_heads, sr_ratio):
    B, N, C = x.shape
    hd = C // num_heads
    scale = hd ** (-0.5)

    q = (x @ params["wq"]).reshape(B, N, num_heads, hd).transpose(0, 2, 1, 3)

    if sr_ratio > 1:
        x_nchw = x.transpose(0, 2, 1).reshape(B, C, H, W)
        y = jax.lax.conv_general_dilated(
            x_nchw, params["w_conv"], window_strides=(sr_ratio, sr_ratio),
            padding="VALID", dimension_numbers=("NCHW", "OIHW", "NCHW"))
        y = y + params["b_sr"][None, :, None, None]
        x_ = y.reshape(B, C, -1).transpose(0, 2, 1)                 # (B, Nk, C)
        mu = x_.mean(-1, keepdims=True)
        var = ((x_ - mu) ** 2).mean(-1, keepdims=True)
        x_ = (x_ - mu) / jnp.sqrt(var + 1e-5) * params["ln_g"] + params["ln_b"]
    else:
        x_ = x

    Nk = x_.shape[1]
    kv = (x_ @ params["wkv"]).reshape(B, Nk, 2, num_heads, hd).transpose(2, 0, 3, 1, 4)
    k, v = kv[0], kv[1]

    attn = jnp.einsum("bhnd,bhmd->bhnm", q, k) * scale
    attn = jax.nn.softmax(attn, axis=-1)
    o = jnp.einsum("bhnm,bhmd->bhnd", attn, v).transpose(0, 2, 1, 3).reshape(B, N, C)
    return o @ params["w_proj"] + params["b_proj"]


# ---------------------------------------------------------------------------
# Deterministic parameter init (shapes from Attention.__init__)
# ---------------------------------------------------------------------------

def init_params(key, dim, sr_ratio):
    ks = jax.random.split(key, 4)
    std = 0.02
    params = {
        "wq": jax.random.normal(ks[0], (dim, dim), jnp.float32) * std,
        "wkv": jax.random.normal(ks[1], (dim, 2 * dim), jnp.float32) * std,
        "w_proj": jax.random.normal(ks[2], (dim, dim), jnp.float32) * std,
        "b_proj": jnp.zeros((dim,), jnp.float32),
    }
    if sr_ratio > 1:
        fan_out = sr_ratio * sr_ratio * dim
        w_conv = jax.random.normal(
            ks[3], (dim, dim, sr_ratio, sr_ratio), jnp.float32) * jnp.sqrt(2.0 / fan_out)
        params["w_conv"] = w_conv                                   # (O, I, kh, kw)
        # per tap-row dh: rows ordered (dw, c_in) -> (sr, sr*C_in, C_out)
        params["w_sr"] = w_conv.transpose(2, 3, 1, 0).reshape(
            sr_ratio, sr_ratio * dim, dim)
        params["b_sr"] = jnp.zeros((dim,), jnp.float32)
        params["ln_g"] = jnp.ones((dim,), jnp.float32)
        params["ln_b"] = jnp.zeros((dim,), jnp.float32)
    return params


if __name__ == "__main__":
    B, C, H, W = 2, 32, 8, 8
    num_heads, sr_ratio = 4, 2
    N = H * W

    key = jax.random.PRNGKey(0)
    kx, kp = jax.random.split(key)
    x = jax.random.normal(kx, (B, N, C), jnp.float32)

    tol = dict(atol=5e-3, rtol=5e-3)   # bf16 MXU operands / activations

    # sr_ratio > 1 path (fused SR conv + LN, single-pass attention)
    params = init_params(kp, C, sr_ratio)
    y = jax.block_until_ready(attention_forward(x, H, W, params, num_heads, sr_ratio))
    y_ref = attention_reference(x, H, W, params, num_heads, sr_ratio)
    assert y.shape == (B, N, C)
    assert jnp.allclose(y, y_ref, **tol), (
        f"sr>1 mismatch: max err {jnp.max(jnp.abs(y - y_ref))}")

    # sr_ratio == 1 path
    params1 = init_params(kp, C, 1)
    y1 = jax.block_until_ready(attention_forward(x, H, W, params1, num_heads, 1))
    y1_ref = attention_reference(x, H, W, params1, num_heads, 1)
    assert jnp.allclose(y1, y1_ref, **tol), (
        f"sr==1 mismatch: max err {jnp.max(jnp.abs(y1 - y1_ref))}")

    # force the online-softmax (multi KV step) fallback to exercise that path too
    y2 = jax.block_until_ready(
        attention_forward(x, H, W, params, num_heads, sr_ratio,
                          attn_single_pass_max_kv=0, attn_tkv=8))
    assert jnp.allclose(y2, y_ref, **tol), (
        f"flash fallback mismatch: max err {jnp.max(jnp.abs(y2 - y_ref))}")

    print("KERNEL_OK")
</pallas_src>

<mosaic_0001>
module attributes {stable_mosaic.version = 11 : i64} {
  func.func @_mm_k1_kernel(%arg0: i32, %arg1: i32, %arg2: memref<64x32xf32, #tpu.memory_space<vmem>>, %arg3: memref<32x32xf32, #tpu.memory_space<vmem>>, %arg4: memref<64x32xbf16, #tpu.memory_space<vmem>>) attributes {dimension_semantics = [#tpu.dimension_semantics<parallel>, #tpu.dimension_semantics<parallel>], iteration_bounds = array<i64: 2, 1>, scalar_prefetch = 0 : i64, scratch_operands = 0 : i64, tpu.core_type = #tpu.core_type<tc>, window_params = [{transform_indices = @transform_0, window_bounds = array<i64: 64, 32>}, {transform_indices = @transform_1, window_bounds = array<i64: 32, 32>}, {transform_indices = @transform_2, window_bounds = array<i64: 64, 32>}]} {
    %c0 = arith.constant 0 : index
    %c0_0 = arith.constant 0 : index
    %0 = vector.load %arg2[%c0, %c0_0] : memref<64x32xf32, #tpu.memory_space<vmem>>, vector<64x32xf32>
    %1 = arith.truncf %0 : vector<64x32xf32> to vector<64x32xbf16>
    %c0_1 = arith.constant 0 : index
    %c0_2 = arith.constant 0 : index
    %2 = vector.load %arg3[%c0_1, %c0_2] : memref<32x32xf32, #tpu.memory_space<vmem>>, vector<32x32xf32>
    %3 = arith.truncf %2 : vector<32x32xf32> to vector<32x32xbf16>
    %cst = arith.constant dense<0.000000e+00> : vector<64x32xf32>
    %4 = tpu.matmul %1, %3, %cst {dimension_numbers = #tpu.dot_dimension_numbers<[1], [0], [0], [1], [0, 0, 1, 1], [], []>} : vector<64x32xbf16>, vector<32x32xbf16>, vector<64x32xf32> -> vector<64x32xf32>
    %5 = arith.truncf %4 : vector<64x32xf32> to vector<64x32xbf16>
    %c0_3 = arith.constant 0 : index
    %c0_4 = arith.constant 0 : index
    %6 = vector.load %arg4[%c0_3, %c0_4] : memref<64x32xbf16, #tpu.memory_space<vmem>>, vector<64x32xbf16>
    tpu.vector_store %arg4[%c0_3, %c0_4], %5 {strides = array<i32>} : memref<64x32xbf16, #tpu.memory_space<vmem>>, vector<64x32xbf16>,
    return
  }
  func.func @transform_0(%arg0: i32, %arg1: i32) -> (i32, i32) {
    %c0_i32 = arith.constant 0 : i32
    %c0_i32_0 = arith.constant 0 : i32
    return %arg0, %c0_i32 : i32, i32
  }
  func.func @transform_1(%arg0: i32, %arg1: i32) -> (i32, i32) {
    %c0_i32 = arith.constant 0 : i32
    %c0_i32_0 = arith.constant 0 : i32
    return %c0_i32, %arg1 : i32, i32
  }
  func.func @transform_2(%arg0: i32, %arg1: i32) -> (i32, i32) {
    %c0_i32 = arith.constant 0 : i32
    return %arg0, %arg1 : i32, i32
  }
}

</mosaic_0001>

<bundles_post_ra>
// kernel: tpu_custom_call.1
= control target key start
LH: loop header
LB: loop body
LE: loop exit
PB: predicated region body
PF: predicated region fallthrough
CT: control target
= control target key end

     0   :  { %s529_s9 = smov 0   ;;  %s531_s10 = smov 0   ;;  %s586_s0 = inlined_call_operand.vmem [shape: f32[128,32], index: 0, kind: input, shape index: {}]   ;;  %s587_s1 = inlined_call_operand.vmem [shape: f32[32,32], index: 1, kind: input, shape index: {}]   ;;  %s588_s2 = inlined_call_operand.vmem [shape: bf16[128,32], index: 2, kind: output, shape index: {}]  }
   0x1   :  { %s533_s11 = smov 0  }
   0x2 LB: > { %s24_s12 = sadd.s32 1, %s508_s10  ;;  %p417_p0 = scmp.ge.s32.totalorder %s512_s11, 1  ;;  %s512_s11 = sphi %s533_s11, %s12_s11   ;;  %s508_s10 = sphi %s531_s10, %s590_s10   ;;  %s504_s9 = sphi %s529_s9, %s589_s9  }
   0x3   : > { %p26_p1 = scmp.ge.s32.totalorder %s24_s12, 2  ;;  %p136_p2 = scmp.lt.s32.totalorder %s512_s11, 3 }
   0x5   : > { %s592_s12 = smov (%p26_p1, %s24_s12), 0  ;;  %p137_p3 = pnand %p417_p0, %p136_p2 }
   0x6   : > { %v197_v0 = vld [vmem:[%s587_s1] sm:$0xff] (!%p137_p3)  ;;  %v198_v1 = vld [vmem:[%s587_s1 + $0x8] sm:$0xff] (!%p137_p3)  ;;  %v199_v2 = vld [vmem:[%s587_s1 + $0x10] sm:$0xff] (!%p137_p3)  ;;  %s418_s19 = sshll.u32 (!%p137_p3), %s504_s9, 3  ;;  %vm203_vm0 = vcmask (!%p137_p3), 261120   ;;  %vm313_vm1 = vcmask (!%p137_p3), 257024  }
   0x7   : > { %140 = sbr.rel (%p137_p3) target bundleno = 240 (0xf0), region = 28  ;;  %v201_v3 = vpack.c.bf16 (!%p137_p3), %v198_v1, %v197_v0  ;;  %v200_v4 = vld [vmem:[%s587_s1 + $0x18] sm:$0xff] (!%p137_p3)  ;;  %p166_p4 = scmp.lt.s32.totalorder (!%p137_p3), %s418_s19, 15 }
   0x8   : > { %v202_v5 = vpack.c.bf16 (!%p137_p3), %v200_v4, %v199_v2 }
   0x9   : > { %450 = vmatprep.subr.bf16.mxu0 (!%p137_p3), %v201_v3  ;;  %462 = vmatprep.subr.bf16.mxu1 (!%p137_p3), %v201_v3 }
   0xa   : > { %451 = vmatpush3.bf16.msra.mxu0 (!%p137_p3), %v201_v3  ;;  %464 = vmatpush3.bf16.msra.mxu1 (!%p137_p3), %v201_v3 }
   0xb   : > { %452 = vmatprep.subr.bf16.mxu0 (!%p137_p3), %v202_v5  ;;  %463 = vmatprep.subr.bf16.mxu1 (!%p137_p3), %v202_v5 }
   0xe   : > { %s594_s19 = smov (!%p166_p4, %s418_s19), 15  ;;  %453 = vmatpush3.bf16.msra.mxu0 %v202_v5  ;;  %465 = vmatpush3.bf16.msra.mxu1 %v202_v5 }
   0xf   : > { %s419_s22 = sshll.u32 %s594_s19, 3  ;;  %s421_s26 = sshll.u32 %s594_s19, 2 }
  0x10   : > { %s169_s25 = scalar_lea.vmem %s586_s0, %s419_s22  ;;  %s182_s29 = scalar_lea.vmem %s588_s2, %s421_s26 }
  0x11   : > { %v185_v6 = vld [vmem:[%s169_s25] sm:$0xff]  ;;  %v186_v7 = vld [vmem:[%s169_s25 + $0x8] sm:$0xff]  ;;  %v187_v11 = vld [vmem:[%s169_s25 + $0x10] sm:$0xff] }
  0x12   : > { %v189_v8 = vld [vmem:[%s169_s25 + $0x20] sm:$0xff]  ;;  %v193_v9 = vpack.c.bf16 %v186_v7, %v185_v6  ;;  %v190_v10 = vld [vmem:[%s169_s25 + $0x28] sm:$0xff]  ;;  %v188_v12 = vld [vmem:[%s169_s25 + $0x18] sm:$0xff] }
  0x13   : > { %v195_v13 = vpack.c.bf16 %v190_v10, %v189_v8  ;;  %v194_v14 = vpack.c.bf16 %v188_v12, %v187_v11  ;;  %v191_v15 = vld [vmem:[%s169_s25 + $0x30] sm:$0xff]  ;;  %v192_v16 = vld [vmem:[%s169_s25 + $0x38] sm:$0xff] }
  0x14   : > { %454 = vmatprep.mubr.msk.bf16.mxu0 %vm203_vm0, %v193_v9  ;;  %v196_v17 = vpack.c.bf16 %v192_v16, %v191_v15 }
  0x15   : > { %458 = vmatprep.mubr.msk.bf16.mxu1 %vm203_vm0, %v195_v13  ;;  %455 = vmatmul.mubr.msk.bf16.vlgmr.msra.gmra.mrb[0].mxu0 %vm203_vm0, %v194_v14 }
  0x16   : > { %459 = vmatmul.mubr.msk.bf16.vlgmr.msra.gmra.mrb[0].mxu1 %vm203_vm0, %v196_v17 }
  0xe8   : > { %v456_v18 = vpop.f32.mrb[0].mxu0 }
  0xe9   : > { %v438_v19 = vpack.c.bf16 %v456_v18, %v456_v18  ;;  %v460_v20 = vpop.f32.mrb[0].mxu1  ;;  %v250_v21 = vpop.f32.mrb[1].mxu0 }
  0xea   : > { %v442_v22 = vpack.c.bf16 %v460_v20, %v460_v20  ;;  %v436_v23 = vpack.c.bf16 %v250_v21, %v250_v21  ;;  %v266_v24 = vpop.f32.mrb[1].mxu1  ;;  %v457_v25 = vpop.f32.mrb[2].mxu0 }
  0xeb   : > { %316 = vst.msk [vmem:[%s182_s29 + $0x8] sm:$0xf] %vm313_vm1, %v438_v19  ;;  %v440_v26 = vpack.c.bf16 %v266_v24, %v266_v24  ;;  %v439_v27 = vpack.c.bf16 %v457_v25, %v457_v25  ;;  %v461_v28 = vpop.f32.mrb[2].mxu1  ;;  %v253_v29 = vpop.f32.mrb[3].mxu0 }
  0xec   : > { %320 = vst.msk [vmem:[%s182_s29 + $0x18] sm:$0xf] %vm313_vm1, %v442_v22  ;;  %314 = vst.msk [vmem:[%s182_s29] sm:$0xf] %vm313_vm1, %v436_v23  ;;  %v443_v30 = vpack.c.bf16 %v461_v28, %v461_v28  ;;  %v437_v31 = vpack.c.bf16 %v253_v29, %v253_v29  ;;  %v269_v32 = vpop.f32.mrb[3].mxu1 }
  0xed   : > { %318 = vst.msk [vmem:[%s182_s29 + $0x10] sm:$0xf] %vm313_vm1, %v440_v26  ;;  %317 = vst.msk [vmem:[%s182_s29 + $0xc] sm:$0xf] %vm313_vm1, %v439_v27  ;;  %v441_v33 = vpack.c.bf16 %v269_v32, %v269_v32 }
  0xee   : > { %321 = vst.msk [vmem:[%s182_s29 + $0x1c] sm:$0xf] %vm313_vm1, %v443_v30  ;;  %315 = vst.msk [vmem:[%s182_s29 + $0x4] sm:$0xf] %vm313_vm1, %v437_v31 }
  0xef   : > { %319 = vst.msk [vmem:[%s182_s29 + $0x14] sm:$0xf] %vm313_vm1, %v441_v33 }
  0xf0 PF: > { %s12_s11 = sadd.s32 1, %s512_s11   ;;  %s589_s9 = smov %s508_s10 }
  0xf1   : > { %p9_p5 = scmp.ge.s32.totalorder %s12_s11, 4   ;;  %s590_s10 = smov %s592_s12 }
  0xf3   :  { %11 = sbr.rel (!%p9_p5) target bundleno = 2 (0x2), region = 61 }

</bundles_post_ra>
